<compile_context>
chip_gen: v6e
topology: v6e:2x2x1
jax: 0.10.0
libtpu: 0.0.40
codegen_flags: <defaults>
</compile_context>

<pallas_src>
import functools

import jax
import jax.numpy as jnp
from jax.experimental import pallas as pl
from jax.experimental.pallas import tpu as pltpu

LANES = 128

_VMEM = pltpu.MemorySpace.VMEM
_SMEM = pltpu.MemorySpace.SMEM


# ---------------------------------------------------------------------------
# Kernels (single invocation; each input is one full lane-dense VMEM block).
# inv_n / weights are Python floats bound at trace time (compile-time consts).
# ---------------------------------------------------------------------------
def _mse_kernel(p_ref, l_ref, out_ref, *, inv_n):
    """Mean squared error."""
    d = p_ref[...] - l_ref[...]
    out_ref[0] = jnp.sum(d * d) * inv_n


def _bce_kernel(x_ref, y_ref, out_ref, *, inv_n):
    """Mean BCE-with-logits (numerically stable form)."""
    x = x_ref[...]          # logits
    y = y_ref[...]          # {0,1} labels
    bce = jnp.maximum(x, 0.0) - x * y + jnp.log1p(jnp.exp(-jnp.abs(x)))
    out_ref[0] = jnp.sum(bce) * inv_n


def _wes_kernel(p_ref, l_ref, out_ref, *, inv_n):
    """Mean label-weighted squared error (weighted error score)."""
    l = l_ref[...]
    d = p_ref[...] - l
    # single nested select: 10x for l>=2, 2x for 0.5<=l<2, else 1x
    w = jnp.where(l >= 2.0, 10.0, jnp.where(l >= 0.5, 2.0, 1.0))
    out_ref[0] = jnp.sum(w * (d * d)) * inv_n


def _mix_kernel(pr_ref, prm_ref, pcw_ref, lr_ref, lrm_ref, lcw_ref, out_ref,
                *, inv_rr, inv_rm, inv_cw, weights):
    """Fused: MSE(rainrate), BCE(rainmask), MSE(cloudwater) + weighted total."""
    dr = pr_ref[...] - lr_ref[...]
    loss_rr = jnp.sum(dr * dr) * inv_rr

    x = prm_ref[...]
    y = lrm_ref[...]
    bce = jnp.maximum(x, 0.0) - x * y + jnp.log1p(jnp.exp(-jnp.abs(x)))
    loss_rm = jnp.sum(bce) * inv_rm

    dc = pcw_ref[...] - lcw_ref[...]
    loss_cw = jnp.sum(dc * dc) * inv_cw

    w0, w1, w2 = weights
    out_ref[0] = loss_rr
    out_ref[1] = loss_rm
    out_ref[2] = loss_cw
    out_ref[3] = w0 * loss_rr + w1 * loss_rm + w2 * loss_cw


# ---------------------------------------------------------------------------
# Wrappers.
# ---------------------------------------------------------------------------
def _flatten_lane_dense(x):
    n = x.size
    assert n % LANES == 0, "total element count must be a multiple of 128"
    return x.reshape(n // LANES, LANES).astype(jnp.float32)


def _call_scalar_kernel(kernel, n_out, *fields):
    flat = [_flatten_lane_dense(t) for t in fields]
    return pl.pallas_call(
        kernel,
        out_shape=jax.ShapeDtypeStruct((n_out,), jnp.float32),
        in_specs=[pl.BlockSpec(memory_space=_VMEM)] * len(flat),
        out_specs=pl.BlockSpec(memory_space=_SMEM),
    )(*flat)


@jax.jit
def _mse_loss(p, l):
    k = functools.partial(_mse_kernel, inv_n=1.0 / p.size)
    return _call_scalar_kernel(k, 1, p, l)[0]


@jax.jit
def _bce_loss(x, y):
    k = functools.partial(_bce_kernel, inv_n=1.0 / x.size)
    return _call_scalar_kernel(k, 1, x, y)[0]


@jax.jit
def _wes_loss(p, l):
    k = functools.partial(_wes_kernel, inv_n=1.0 / p.size)
    return _call_scalar_kernel(k, 1, p, l)[0]


@functools.partial(jax.jit, static_argnames=("weights",))
def _mix_losses(p_rainrate, p_rainmask, p_cloudwater,
                l_rainrate, l_rainmask, l_cloudwater, weights):
    """Returns (loss_rainrate, loss_rainmask, loss_cloudwater, weighted_total)."""
    k = functools.partial(
        _mix_kernel,
        inv_rr=1.0 / p_rainrate.size,
        inv_rm=1.0 / p_rainmask.size,
        inv_cw=1.0 / p_cloudwater.size,
        weights=weights,
    )
    out = _call_scalar_kernel(k, 4,
                              p_rainrate, p_rainmask, p_cloudwater,
                              l_rainrate, l_rainmask, l_cloudwater)
    return out[0], out[1], out[2], out[3]


class MTLLossCW:
    """JAX/Pallas port of MTLLoss_CW (forward pass only)."""

    def __init__(self, strategy, loss_weight):
        self.strategy = strategy
        self.loss_weight = tuple(float(w) for w in loss_weight)

    # epoch-window predicates (host-side Python, same as the PyTorch module)
    def _in(self, epoch, key):
        s = self.strategy
        return s[f"{key}_start"] <= epoch < s[f"{key}_end"]

    def __call__(self, p_rainrate, p_rainmask, p_cloudwater,
                 l_rainrate, l_rainmask, l_cloudwater, epoch):
        if self._in(epoch, "rainrate"):
            return _mse_loss(p_rainrate, l_rainrate)
        elif self._in(epoch, "rainmask"):
            return _bce_loss(p_rainmask, l_rainmask)
        elif self._in(epoch, "cloudwater"):
            return _mse_loss(p_cloudwater, l_cloudwater)
        elif self._in(epoch, "mix"):
            _, _, _, total = _mix_losses(
                p_rainrate, p_rainmask, p_cloudwater,
                l_rainrate, l_rainmask, l_cloudwater, self.loss_weight)
            return total
        elif self._in(epoch, "wes"):
            return _wes_loss(p_rainrate, l_rainrate)
        else:
            raise RuntimeError("undefined epoch num!")

    def get_lossbreak(self, p_rainrate, p_rainmask, p_cloudwater,
                      l_rainrate, l_rainmask, l_cloudwater, epoch):
        if self._in(epoch, "mix"):
            lrr, lrm, lcw, _ = _mix_losses(
                p_rainrate, p_rainmask, p_cloudwater,
                l_rainrate, l_rainmask, l_cloudwater, self.loss_weight)
            return [epoch, float(lrr), float(lrm), float(lcw)]
        return [epoch, float("nan"), float("nan"), float("nan")]


# ---------------------------------------------------------------------------
# Pure-JAX references for sanity checking.
# ---------------------------------------------------------------------------
def _ref_mse(p, l):
    d = p - l
    return jnp.mean(d * d)


def _ref_bce(x, y):
    return jnp.mean(jnp.maximum(x, 0.0) - x * y + jnp.log1p(jnp.exp(-jnp.abs(x))))


def _ref_wes(p, l):
    d = p - l
    w = jnp.where(l >= 2.0, 10.0, jnp.where(l >= 0.5, 2.0, 1.0))
    return jnp.mean(w * d * d)


if __name__ == "__main__":
    # deterministic synthetic inputs, NCHW = (2, 4, 16, 16)
    key = jax.random.PRNGKey(0)
    k1, k2, k3, k4, k5, k6 = jax.random.split(key, 6)
    shape = (2, 4, 16, 16)

    p_rainrate = jax.random.uniform(k1, shape, jnp.float32) * 4.0
    l_rainrate = jax.random.uniform(k2, shape, jnp.float32) * 4.0
    p_rainmask = jax.random.normal(k3, shape, jnp.float32)          # logits
    l_rainmask = jax.random.bernoulli(k4, 0.3, shape).astype(jnp.float32)
    p_cloudwater = jax.random.normal(k5, shape, jnp.float32)
    l_cloudwater = jax.random.normal(k6, shape, jnp.float32)

    strategy = {
        "rainrate_start": 0, "rainrate_end": 10,
        "rainmask_start": 10, "rainmask_end": 20,
        "cloudwater_start": 20, "cloudwater_end": 30,
        "cloudice_start": 0, "cloudice_end": 0,
        "mix_start": 30, "mix_end": 40,
        "weighted_mix_start": 0, "weighted_mix_end": 0,
        "wes_start": 40, "wes_end": 50,
    }
    loss_weight = [1.0, 0.5, 2.0]

    mtl = MTLLossCW(strategy, loss_weight)
    args = (p_rainrate, p_rainmask, p_cloudwater,
            l_rainrate, l_rainmask, l_cloudwater)

    # exercise every branch / kernel
    loss_rr = jax.block_until_ready(mtl(*args, epoch=5))     # rainrate (MSE)
    loss_rm = jax.block_until_ready(mtl(*args, epoch=15))    # rainmask (BCE)
    loss_cw = jax.block_until_ready(mtl(*args, epoch=25))    # cloudwater (MSE)
    loss_mix = jax.block_until_ready(mtl(*args, epoch=35))   # mix (fused)
    loss_wes = jax.block_until_ready(mtl(*args, epoch=45))   # wes (weighted MSE)
    lossbreak = mtl.get_lossbreak(*args, epoch=35)

    # reference checks
    ref_rr = _ref_mse(p_rainrate, l_rainrate)
    ref_rm = _ref_bce(p_rainmask, l_rainmask)
    ref_cw = _ref_mse(p_cloudwater, l_cloudwater)
    ref_mix = (loss_weight[0] * ref_rr + loss_weight[1] * ref_rm
               + loss_weight[2] * ref_cw)
    ref_wes = _ref_wes(p_rainrate, l_rainrate)

    assert jnp.allclose(loss_rr, ref_rr, rtol=1e-5, atol=1e-6)
    assert jnp.allclose(loss_rm, ref_rm, rtol=1e-5, atol=1e-6)
    assert jnp.allclose(loss_cw, ref_cw, rtol=1e-5, atol=1e-6)
    assert jnp.allclose(loss_mix, ref_mix, rtol=1e-5, atol=1e-6)
    assert jnp.allclose(loss_wes, ref_wes, rtol=1e-5, atol=1e-6)
    assert jnp.allclose(jnp.array(lossbreak[1:]),
                        jnp.array([ref_rr, ref_rm, ref_cw]),
                        rtol=1e-5, atol=1e-6)
    assert all(bool(jnp.isfinite(v)) for v in
               (loss_rr, loss_rm, loss_cw, loss_mix, loss_wes))

    print("KERNEL_OK")
</pallas_src>

<mosaic_0001>
module attributes {stable_mosaic.version = 11 : i64} {
  func.func @_mse_kernel(%arg0: memref<16x128xf32, #tpu.memory_space<vmem>>, %arg1: memref<16x128xf32, #tpu.memory_space<vmem>>, %arg2: memref<1xf32, #tpu.memory_space<smem>>) attributes {dimension_semantics = [], scalar_prefetch = 0 : i64, scratch_operands = 0 : i64, tpu.core_type = #tpu.core_type<tc>} {
    %c0 = arith.constant 0 : index
    %c0_0 = arith.constant 0 : index
    %0 = vector.load %arg0[%c0, %c0_0] : memref<16x128xf32, #tpu.memory_space<vmem>>, vector<16x128xf32>
    %c0_1 = arith.constant 0 : index
    %c0_2 = arith.constant 0 : index
    %1 = vector.load %arg1[%c0_1, %c0_2] : memref<16x128xf32, #tpu.memory_space<vmem>>, vector<16x128xf32>
    %2 = arith.subf %0, %1 : vector<16x128xf32>
    %3 = arith.mulf %2, %2 : vector<16x128xf32>
    %4 = vector.shape_cast %3 : vector<16x128xf32> to vector<1x16x128xf32>
    %cst = arith.constant dense<0.000000e+00> : vector<1xf32>
    %5 = vector.multi_reduction <add>, %4, %cst [1, 2] : vector<1x16x128xf32> to vector<1xf32>
    %6 = vector.shape_cast %5 : vector<1xf32> to vector<1x1x1xf32>
    %7 = vector.extract %6[0, 0, 0] : f32 from vector<1x1x1xf32>
    %cst_3 = arith.constant 4.8828125E-4 : f32
    %8 = arith.mulf %7, %cst_3 : f32
    %c0_4 = arith.constant 0 : index
    %9 = memref.load %arg2[%c0_4] : memref<1xf32, #tpu.memory_space<smem>>
    memref.store %8, %arg2[%c0_4] : memref<1xf32, #tpu.memory_space<smem>>
    return
  }
}

</mosaic_0001>

<bundles_post_ra>
// kernel: _mse_loss.1
= control target key start
LH: loop header
LB: loop body
LE: loop exit
PB: predicated region body
PF: predicated region fallthrough
CT: control target
= control target key end

     0   :  { %s90_s0 = inlined_call_operand.vmem [shape: f32[16,128], index: 0, kind: input, shape index: {}]   ;;  %s91_s1 = inlined_call_operand.vmem [shape: f32[16,128], index: 1, kind: input, shape index: {}]   ;;  %s92_s2 = inlined_call_operand.hbm [shape: f32[1], index: 2, kind: output, shape index: {}]  }
   0x1   :  { %v12_v0 = vld [vmem:[%s90_s0] sm:$0xff]  ;;  %v13_v1 = vld [vmem:[%s90_s0 + $0x8] sm:$0xff] }
   0x2   :  { %v14_v2 = vld [vmem:[%s91_s1] sm:$0xff]  ;;  %v15_v3 = vld [vmem:[%s91_s1 + $0x8] sm:$0xff] }
   0x3   :  { %v16_v4 = vsub.f32 %v12_v0, %v14_v2 }
   0x4   :  { %7 = vsyncpa [#allocation3], 0  ;;  %v17_v5 = vsub.f32 %v13_v1, %v15_v3  ;;  %s59_s18 = smov [#allocation2]  }
   0x5   :  { %v18_v6 = vmul.f32 %v16_v4, %v16_v4 }
   0x6   :  { %v19_v7 = vmul.f32 %v17_v5, %v17_v5 }
   0x8   :  { %v20_v8 = vadd.f32 %v19_v7, %v18_v6 }
   0xa   :  { %21 = vadd.xlane.f32.xlu0 %v20_v8 }
  0x93   :  { %v22_v9 = vpop.xlane.xlu0 %21 }
  0x94   :  { %v23_v10 = vrot.slane %v22_v9, 4 }
  0x96   :  { %v24_v11 = vadd.f32 %v23_v10, %v22_v9 }
  0x98   :  { %v25_v12 = vrot.slane %v24_v11, 2 }
  0x9a   :  { %v26_v13 = vadd.f32 %v25_v12, %v24_v11 }
  0x9c   :  { %v27_v14 = vrot.slane %v26_v13, 1 }
  0x9e   :  { %v28_v15 = vadd.f32 %v27_v14, %v26_v13 }
  0xa0   :  { %46 = vpush %v28_v15 }
  0xd1   :  { %s47_s0 = spop %46 }
  0xd2   :  { %s30_s17 = smul.f32 0.00048828125, %s47_s0 }
  0xd4   :  { %32 = sst [smem:[#allocation2]] %s30_s17 }
  0xd5   :  { %40 = dma.smem_to_hbm %s59_s18, 16, %s92_s2, [#allocation3]  }
  0xd6   :  { %57 = dma.done.wait [#allocation3], 16  }
  0xd7   :  { %58 = vsyncadd [#allocation3], 4294967280 }
  0xd8   :  { %44 = sfence }
  0xd9   :  { %45 = vsyncpa [#allocation3], 1 }

</bundles_post_ra>
